<compile_context>
chip_gen: v7x
topology: tpu7x:2x2x1
jax: 0.10.0
libtpu: 0.0.40
codegen_flags: <defaults>
</compile_context>

<pallas_src>
import jax
import jax.numpy as jnp
from jax.experimental import pallas as pl
from jax.experimental.pallas import tpu as pltpu

QUANTILES = [0.05, 0.5, 0.95]
HIDDEN = 64
IN_SHAPE = 1


def _round_up(x, m):
    return ((x + m - 1) // m) * m


def _orthogonal(key, rows, cols):
    """Deterministic orthogonal init (rows x cols), same spirit as nn.init.orthogonal_."""
    n, m = max(rows, cols), min(rows, cols)
    a = jax.random.normal(key, (n, m), dtype=jnp.float32)
    q, r = jnp.linalg.qr(a)
    q = q * jnp.sign(jnp.diagonal(r))[None, :]
    if rows < cols:
        q = q.T
    return q[:rows, :cols]


def _qmodel_kernel(x_ref, w1_ref, b1_ref, w2_ref, b2_ref, w3_ref, b3_ref, o_ref):
    # x:  [TB, 1] f32     w1: [1, 64] f32    b1: [1, 64] f32
    # w2: [64, 64] bf16   b2: [1, 64] f32
    # w3: [64, 3]  bf16   b3: [1, 3]  f32    o:  [TB, 3] f32
    x = x_ref[...]
    # Layer 1: K=1 matmul replaced by a VPU broadcast multiply (f32 elementwise).
    h1 = jnp.maximum(x * w1_ref[...] + b1_ref[...], 0.0)        # [TB, 64] f32
    # Dropout -> identity (eval mode).
    # Layer 2: bf16 MXU inputs, f32 accumulation; bias/ReLU in f32.
    h2 = jnp.dot(h1.astype(jnp.bfloat16), w2_ref[...],
                 preferred_element_type=jnp.float32) + b2_ref[...]
    h2 = jnp.maximum(h2, 0.0)                                    # [TB, 64] f32
    # Fused quantile heads: [TB, 64] @ [64, 3], bf16 in / f32 acc.
    out = jnp.dot(h2.astype(jnp.bfloat16), w3_ref[...],
                  preferred_element_type=jnp.float32) + b3_ref[...]
    o_ref[...] = out.astype(o_ref.dtype)


def q_model_forward(x, params, *, tile_b=1024):
    """x: [B, IN_SHAPE] float32 -> [B, num_quantiles] float32."""
    w1, b1, w2, b2, w3, b3 = params
    B = x.shape[0]
    nq = w3.shape[1]

    # bf16 weights for the MXU dots; layer-1 weight and all biases stay f32.
    w2_bf = w2.astype(jnp.bfloat16)
    w3_bf = w3.astype(jnp.bfloat16)

    # Pick a batch tile: multiple of 8 (sublane), capped by tile_b. Pad B up to
    # a multiple of the tile so every grid step sees a full, unmasked block.
    tb = _round_up(min(tile_b, _round_up(B, 8)), 8)
    Bp = _round_up(B, tb)
    if Bp != B:
        x = jnp.pad(x, ((0, Bp - B), (0, 0)))
    n_tiles = Bp // tb

    def resident(shape):
        return pl.BlockSpec(shape, lambda i: tuple(0 for _ in shape))

    flops = 2 * Bp * (HIDDEN + HIDDEN * HIDDEN + HIDDEN * nq)
    bytes_accessed = (
        4 * Bp * (IN_SHAPE + nq)
        + 4 * (w1.size + b1.size + b2.size + b3.size)
        + 2 * (w2_bf.size + w3_bf.size)
    )

    out = pl.pallas_call(
        _qmodel_kernel,
        out_shape=jax.ShapeDtypeStruct((Bp, nq), jnp.float32),
        grid=(n_tiles,),
        in_specs=[
            pl.BlockSpec((tb, IN_SHAPE), lambda i: (i, 0)),   # x: tiled on batch
            resident(w1.shape), resident(b1.shape),           # weights: VMEM-resident
            resident(w2_bf.shape), resident(b2.shape),
            resident(w3_bf.shape), resident(b3.shape),
        ],
        out_specs=pl.BlockSpec((tb, nq), lambda i: (i, 0)),
        compiler_params=pltpu.CompilerParams(
            dimension_semantics=("parallel",),
            vmem_limit_bytes=32 << 20,
        ),
        cost_estimate=pl.CostEstimate(
            flops=flops, transcendentals=0, bytes_accessed=bytes_accessed),
    )(x, w1, b1, w2_bf, b2, w3_bf, b3)

    return out[:B]


def init_params(key):
    k1, k2, k3, k4, k5 = jax.random.split(key, 5)
    nq = len(QUANTILES)
    # PyTorch Linear weights are [out, in]; we store the transpose [in, out].
    w1 = _orthogonal(k1, HIDDEN, IN_SHAPE).T              # [1, 64]
    b1 = jnp.zeros((1, HIDDEN), jnp.float32)
    w2 = _orthogonal(k2, HIDDEN, HIDDEN).T                 # [64, 64]
    b2 = jnp.zeros((1, HIDDEN), jnp.float32)
    heads = [_orthogonal(k, 1, HIDDEN).T for k in (k3, k4, k5)]   # each [64, 1]
    w3 = jnp.concatenate(heads, axis=1)                    # [64, 3]
    b3 = jnp.zeros((1, nq), jnp.float32)
    return (w1, b1, w2, b2, w3, b3)


def _reference(x, params):
    """Same math as the kernel (bf16 MXU inputs, f32 accumulation)."""
    w1, b1, w2, b2, w3, b3 = params
    h1 = jnp.maximum(x * w1 + b1, 0.0)
    h2 = jnp.maximum(
        jnp.dot(h1.astype(jnp.bfloat16), w2.astype(jnp.bfloat16),
                preferred_element_type=jnp.float32) + b2, 0.0)
    return jnp.dot(h2.astype(jnp.bfloat16), w3.astype(jnp.bfloat16),
                   preferred_element_type=jnp.float32) + b3


if __name__ == "__main__":
    key = jax.random.PRNGKey(0)
    pkey, xkey = jax.random.split(key)
    params = init_params(pkey)

    # Small but multi-tile + non-divisible batch to exercise the grid & padding.
    B = 260
    x = jax.random.normal(xkey, (B, IN_SHAPE), dtype=jnp.float32)

    out = q_model_forward(x, params, tile_b=128)
    out = jax.block_until_ready(out)

    ref = _reference(x, params)
    assert out.shape == (B, len(QUANTILES)), out.shape
    assert jnp.allclose(out, ref, atol=1e-3, rtol=1e-3), "mismatch vs reference"

    print("KERNEL_OK")
</pallas_src>

<mosaic_0001>
module attributes {stable_mosaic.version = 11 : i64} {
  func.func @_qmodel_kernel(%arg0: i32, %arg1: memref<128x1xf32, #tpu.memory_space<vmem>>, %arg2: memref<1x64xf32, #tpu.memory_space<vmem>>, %arg3: memref<1x64xf32, #tpu.memory_space<vmem>>, %arg4: memref<64x64xbf16, #tpu.memory_space<vmem>>, %arg5: memref<1x64xf32, #tpu.memory_space<vmem>>, %arg6: memref<64x3xbf16, #tpu.memory_space<vmem>>, %arg7: memref<1x3xf32, #tpu.memory_space<vmem>>, %arg8: memref<128x3xf32, #tpu.memory_space<vmem>>) attributes {dimension_semantics = [#tpu.dimension_semantics<parallel>], iteration_bounds = array<i64: 3>, scalar_prefetch = 0 : i64, scratch_operands = 0 : i64, tpu.core_type = #tpu.core_type<tc>, window_params = [{transform_indices = @transform_0, window_bounds = array<i64: 128, 1>}, {pipeline_mode = #tpu.pipeline_mode<synchronous>, transform_indices = @transform_1, window_bounds = array<i64: 1, 64>}, {pipeline_mode = #tpu.pipeline_mode<synchronous>, transform_indices = @transform_2, window_bounds = array<i64: 1, 64>}, {pipeline_mode = #tpu.pipeline_mode<synchronous>, transform_indices = @transform_3, window_bounds = array<i64: 64, 64>}, {pipeline_mode = #tpu.pipeline_mode<synchronous>, transform_indices = @transform_4, window_bounds = array<i64: 1, 64>}, {pipeline_mode = #tpu.pipeline_mode<synchronous>, transform_indices = @transform_5, window_bounds = array<i64: 64, 3>}, {pipeline_mode = #tpu.pipeline_mode<synchronous>, transform_indices = @transform_6, window_bounds = array<i64: 1, 3>}, {transform_indices = @transform_7, window_bounds = array<i64: 128, 3>}]} {
    %c0 = arith.constant 0 : index
    %c0_0 = arith.constant 0 : index
    %0 = vector.load %arg1[%c0, %c0_0] : memref<128x1xf32, #tpu.memory_space<vmem>>, vector<128x1xf32>
    %c0_1 = arith.constant 0 : index
    %c0_2 = arith.constant 0 : index
    %1 = vector.load %arg2[%c0_1, %c0_2] : memref<1x64xf32, #tpu.memory_space<vmem>>, vector<1x64xf32>
    %2 = vector.broadcast %0 : vector<128x1xf32> to vector<128x64xf32>
    %3 = vector.broadcast %1 : vector<1x64xf32> to vector<128x64xf32>
    %4 = arith.mulf %2, %3 : vector<128x64xf32>
    %c0_3 = arith.constant 0 : index
    %c0_4 = arith.constant 0 : index
    %5 = vector.load %arg3[%c0_3, %c0_4] : memref<1x64xf32, #tpu.memory_space<vmem>>, vector<1x64xf32>
    %6 = vector.broadcast %5 : vector<1x64xf32> to vector<128x64xf32>
    %7 = arith.addf %4, %6 : vector<128x64xf32>
    %cst = arith.constant 0.000000e+00 : f32
    %8 = vector.broadcast %cst : f32 to vector<128x64xf32>
    %9 = arith.maximumf %7, %8 : vector<128x64xf32>
    %10 = arith.truncf %9 : vector<128x64xf32> to vector<128x64xbf16>
    %c0_5 = arith.constant 0 : index
    %c0_6 = arith.constant 0 : index
    %11 = vector.load %arg4[%c0_5, %c0_6] : memref<64x64xbf16, #tpu.memory_space<vmem>>, vector<64x64xbf16>
    %cst_7 = arith.constant dense<0.000000e+00> : vector<128x64xf32>
    %12 = tpu.matmul %10, %11, %cst_7 {dimension_numbers = #tpu.dot_dimension_numbers<[1], [0], [0], [1], [0, 0, 1, 1], [], []>} : vector<128x64xbf16>, vector<64x64xbf16>, vector<128x64xf32> -> vector<128x64xf32>
    %c0_8 = arith.constant 0 : index
    %c0_9 = arith.constant 0 : index
    %13 = vector.load %arg5[%c0_8, %c0_9] : memref<1x64xf32, #tpu.memory_space<vmem>>, vector<1x64xf32>
    %14 = vector.broadcast %13 : vector<1x64xf32> to vector<128x64xf32>
    %15 = arith.addf %12, %14 : vector<128x64xf32>
    %cst_10 = arith.constant 0.000000e+00 : f32
    %16 = vector.broadcast %cst_10 : f32 to vector<128x64xf32>
    %17 = arith.maximumf %15, %16 : vector<128x64xf32>
    %18 = arith.truncf %17 : vector<128x64xf32> to vector<128x64xbf16>
    %c0_11 = arith.constant 0 : index
    %c0_12 = arith.constant 0 : index
    %19 = vector.load %arg6[%c0_11, %c0_12] : memref<64x3xbf16, #tpu.memory_space<vmem>>, vector<64x3xbf16>
    %cst_13 = arith.constant dense<0.000000e+00> : vector<128x3xf32>
    %20 = tpu.matmul %18, %19, %cst_13 {dimension_numbers = #tpu.dot_dimension_numbers<[1], [0], [0], [1], [0, 0, 1, 1], [], []>} : vector<128x64xbf16>, vector<64x3xbf16>, vector<128x3xf32> -> vector<128x3xf32>
    %c0_14 = arith.constant 0 : index
    %c0_15 = arith.constant 0 : index
    %21 = vector.load %arg7[%c0_14, %c0_15] : memref<1x3xf32, #tpu.memory_space<vmem>>, vector<1x3xf32>
    %22 = vector.broadcast %21 : vector<1x3xf32> to vector<128x3xf32>
    %23 = arith.addf %20, %22 : vector<128x3xf32>
    %c0_16 = arith.constant 0 : index
    %c0_17 = arith.constant 0 : index
    %24 = vector.load %arg8[%c0_16, %c0_17] : memref<128x3xf32, #tpu.memory_space<vmem>>, vector<128x3xf32>
    tpu.vector_store %arg8[%c0_16, %c0_17], %23 {strides = array<i32>} : memref<128x3xf32, #tpu.memory_space<vmem>>, vector<128x3xf32>,
    return
  }
  func.func @transform_0(%arg0: i32) -> (i32, i32) {
    %c0_i32 = arith.constant 0 : i32
    %c0_i32_0 = arith.constant 0 : i32
    return %arg0, %c0_i32 : i32, i32
  }
  func.func @transform_1(%arg0: i32) -> (i32, i32) {
    %c0_i32 = arith.constant 0 : i32
    %c0_i32_0 = arith.constant 0 : i32
    %c0_i32_1 = arith.constant 0 : i32
    return %c0_i32, %c0_i32_0 : i32, i32
  }
  func.func @transform_2(%arg0: i32) -> (i32, i32) {
    %c0_i32 = arith.constant 0 : i32
    %c0_i32_0 = arith.constant 0 : i32
    %c0_i32_1 = arith.constant 0 : i32
    return %c0_i32, %c0_i32_0 : i32, i32
  }
  func.func @transform_3(%arg0: i32) -> (i32, i32) {
    %c0_i32 = arith.constant 0 : i32
    %c0_i32_0 = arith.constant 0 : i32
    %c0_i32_1 = arith.constant 0 : i32
    return %c0_i32, %c0_i32_0 : i32, i32
  }
  func.func @transform_4(%arg0: i32) -> (i32, i32) {
    %c0_i32 = arith.constant 0 : i32
    %c0_i32_0 = arith.constant 0 : i32
    %c0_i32_1 = arith.constant 0 : i32
    return %c0_i32, %c0_i32_0 : i32, i32
  }
  func.func @transform_5(%arg0: i32) -> (i32, i32) {
    %c0_i32 = arith.constant 0 : i32
    %c0_i32_0 = arith.constant 0 : i32
    %c0_i32_1 = arith.constant 0 : i32
    return %c0_i32, %c0_i32_0 : i32, i32
  }
  func.func @transform_6(%arg0: i32) -> (i32, i32) {
    %c0_i32 = arith.constant 0 : i32
    %c0_i32_0 = arith.constant 0 : i32
    %c0_i32_1 = arith.constant 0 : i32
    return %c0_i32, %c0_i32_0 : i32, i32
  }
  func.func @transform_7(%arg0: i32) -> (i32, i32) {
    %c0_i32 = arith.constant 0 : i32
    %c0_i32_0 = arith.constant 0 : i32
    return %arg0, %c0_i32 : i32, i32
  }
}

</mosaic_0001>

<bundles_post_ra>
// kernel: tpu_custom_call.1
= control target key start
LH: loop header
LB: loop body
LE: loop exit
PB: predicated region body
PF: predicated region fallthrough
CT: control target
= control target key end

     0   :  { %s1046_s24 = smov 0   ;;  %s1210_s0 = inlined_call_operand.vmem [shape: f32[384,1], index: 0, kind: input, shape index: {}]   ;;  %s1211_s1 = inlined_call_operand.vmem [shape: f32[1,64], index: 1, kind: input, shape index: {}]   ;;  %s1212_s2 = inlined_call_operand.vmem [shape: f32[1,64], index: 2, kind: input, shape index: {}]   ;;  %s1213_s3 = inlined_call_operand.vmem [shape: bf16[64,64], index: 3, kind: input, shape index: {}]   ;;  %s1214_s4 = inlined_call_operand.vmem [shape: f32[1,64], index: 4, kind: input, shape index: {}]   ;;  %s1215_s5 = inlined_call_operand.vmem [shape: bf16[64,3], index: 5, kind: input, shape index: {}]   ;;  %s1216_s6 = inlined_call_operand.vmem [shape: f32[1,3], index: 6, kind: input, shape index: {}]   ;;  %s1217_s7 = inlined_call_operand.vmem [shape: f32[384,3], index: 7, kind: output, shape index: {}]  }
   0x1 LB: > { %s867_s25 = sadd.s32 4294967295, %s1003_s24   ;;  %p871_p0 = scmp.ge.s32.totalorder %s1003_s24, 1  ;;  %s1003_s24 = sphi %s1046_s24, %s17_s24  }
   0x2   : > { %p238_p1 = scmp.lt.s32.totalorder %s1003_s24, 4 }
   0x4   : > { %p239_p2 = pnand %p871_p0, %p238_p1 }
   0x5   : > { %s872_s26 = sshll.u32 (!%p239_p2), %s867_s25, 4  ;;  %v1005_v0 = vmov (!%p239_p2), 0   ;;  %v989_v1 = vld [vmem:[%s1213_s3] sm:$0xff] (!%p239_p2)   ;;  %v990_v7 = vld [vmem:[%s1213_s3 + $0x8] sm:$0xff] (!%p239_p2)   ;;  %v991_v9 = vld [vmem:[%s1213_s3 + $0x10] sm:$0xff] (!%p239_p2)   ;;  %vm488_vm0 = vcmask (!%p239_p2), 523264  }
   0x6   : > { %242 = sbr.rel (%p239_p2) target bundleno = 622 (0x26e), region = 48  ;;  %988 = vset.pattern.permute.xlu1 (!%p239_p2), %v1005_v0  ;;  %987 = vset.pattern.permute.xlu0 (!%p239_p2), %v1005_v0  ;;  %p271_p3 = scmp.lt.s32.totalorder (!%p239_p2), %s872_s26, 47  ;;  %v992_v12 = vld [vmem:[%s1213_s3 + $0x18] sm:$0xff] (!%p239_p2)   ;;  %v993_v21 = vld [vmem:[%s1215_s5] sm:$0xff] (!%p239_p2)   ;;  %v994_v22 = vld [vmem:[%s1215_s5 + $0x8] sm:$0xff] (!%p239_p2)   ;;  %vm794_vm1 = vcmask (!%p239_p2), 23552  }
   0x7   : > { %930 = vmatprep.subr.bf16.mxu0 (!%p239_p2), %v989_v1  ;;  %954 = vmatprep.subr.bf16.mxu1 (!%p239_p2), %v993_v21  ;;  %v1101_v23 = vld [vmem:[%s1211_s1] ss:$0 sm:$0xff] (!%p239_p2) }
   0x8   : > { %931 = vmatpush3.bf16.msra.mxu0 (!%p239_p2), %v989_v1  ;;  %955 = vmatpush3.bf16.msra.mxu1 (!%p239_p2), %v993_v21  ;;  %v1106_v26 = vld [vmem:[%s1212_s2] ss:$0 sm:$0xff] (!%p239_p2) }
   0x9   : > { %932 = vmatprep.subr.bf16.mxu0 (!%p239_p2), %v990_v7  ;;  %956 = vmatprep.subr.bf16.mxu1 (!%p239_p2), %v994_v22 }
   0xc   : > { %933 = vmatpush3.bf16.msra.mxu0 (!%p239_p2), %v990_v7  ;;  %957 = vmatpush3.bf16.msra.mxu1 (!%p239_p2), %v994_v22 }
   0xd   : > { %s1219_s26 = smov (!%p271_p3, %s872_s26), 47  ;;  %934 = vmatprep.subr.bf16.mxu0 %v991_v9 }
   0xe   : > { %s873_s29 = sshll.u32 %s1219_s26, 3 }
   0xf   : > { %s1065_s9 = scalar_lea.vmem %s1210_s0, %s873_s29  ;;  %s1173_s14 = scalar_lea.vmem %s1217_s7, %s873_s29 }
  0x10   : > { %v285_v2 = vld [vmem:[%s1065_s9 + $0x10] sm:$0xff]  ;;  %v283_v3 = vld [vmem:[%s1065_s9] sm:$0xff]  ;;  %v286_v4 = vld [vmem:[%s1065_s9 + $0x18] sm:$0xff]  ;;  %935 = vmatpush3.bf16.msra.mxu0 %v991_v9 }
  0x11   : > { %312 = vperm.xlu1 %988, %v285_v2   ;;  %302 = vperm.xlu0 %987, %v283_v3   ;;  %v284_v5 = vld [vmem:[%s1065_s9 + $0x8] sm:$0xff]  ;;  %v287_v8 = vld [vmem:[%s1065_s9 + $0x20] sm:$0xff]  ;;  %v290_v10 = vld [vmem:[%s1065_s9 + $0x38] sm:$0xff] }
  0x12   : > { %v288_v6 = vld [vmem:[%s1065_s9 + $0x28] sm:$0xff]  ;;  %v289_v11 = vld [vmem:[%s1065_s9 + $0x30] sm:$0xff]  ;;  %v291_v14 = vld [vmem:[%s1065_s9 + $0x40] sm:$0xff]  ;;  %936 = vmatprep.subr.bf16.mxu0 %v992_v12 }
  0x13   : > { %v292_v13 = vld [vmem:[%s1065_s9 + $0x48] sm:$0xff]  ;;  %v294_v15 = vld [vmem:[%s1065_s9 + $0x58] sm:$0xff]  ;;  %v293_v16 = vld [vmem:[%s1065_s9 + $0x50] sm:$0xff] }
  0x14   : > { %937 = vmatpush3.bf16.msra.mxu0 %v992_v12  ;;  %v296_v17 = vld [vmem:[%s1065_s9 + $0x68] sm:$0xff]  ;;  %v295_v18 = vld [vmem:[%s1065_s9 + $0x60] sm:$0xff]  ;;  %v298_v19 = vld [vmem:[%s1065_s9 + $0x78] sm:$0xff] }
  0x15   : > { %317 = vperm.xlu1 %988, %v286_v4   ;;  %307 = vperm.xlu0 %987, %v284_v5   ;;  %v297_v20 = vld [vmem:[%s1065_s9 + $0x70] sm:$0xff] }
  0x19   : > { %327 = vperm.xlu1 %988, %v288_v6   ;;  %322 = vperm.xlu0 %987, %v287_v8  }
  0x1d   : > { %337 = vperm.xlu1 %988, %v290_v10   ;;  %332 = vperm.xlu0 %987, %v289_v11  }
  0x21   : > { %347 = vperm.xlu1 %988, %v292_v13   ;;  %342 = vperm.xlu0 %987, %v291_v14  }
  0x25   : > { %357 = vperm.xlu1 %988, %v294_v15   ;;  %352 = vperm.xlu0 %987, %v293_v16  }
  0x29   : > { %367 = vperm.xlu1 %988, %v296_v17   ;;  %362 = vperm.xlu0 %987, %v295_v18  }
  0x2d   : > { %377 = vperm.xlu1 %988, %v298_v19   ;;  %372 = vperm.xlu0 %987, %v297_v20  }
  0x90   : > { %v313_v24 = vpop.permute.xlu1 %312  ;;  %v303_v25 = vpop.permute.xlu0 %302 }
  0x91   : > { %v388_v27 = vmul.f32 %v1101_v23, %v313_v24  ;;  %v386_v28 = vmul.f32 %v1101_v23, %v303_v25 }
  0x93   : > { %v411_v29 = vadd.f32 %v1106_v26, %v388_v27  ;;  %v409_v30 = vadd.f32 %v1106_v26, %v386_v28 }
  0x94   : > { %v318_v31 = vpop.permute.xlu1 %317  ;;  %v308_v32 = vpop.permute.xlu0 %307 }
  0x95   : > { %v389_v33 = vmul.f32 %v1101_v23, %v318_v31  ;;  %v387_v34 = vmul.f32 %v1101_v23, %v308_v32  ;;  %v427_v37 = vmax.f32 %v411_v29, 0.0  ;;  %v425_v38 = vmax.f32 %v409_v30, 0.0 }
  0x97   : > { %v412_v35 = vadd.f32 %v1106_v26, %v389_v33  ;;  %v410_v36 = vadd.f32 %v1106_v26, %v387_v34 }
  0x98   : > { %v328_v39 = vpop.permute.xlu1 %327  ;;  %v323_v40 = vpop.permute.xlu0 %322 }
  0x99   : > { %v428_v41 = vmax.f32 %v412_v35, 0.0  ;;  %v426_v42 = vmax.f32 %v410_v36, 0.0  ;;  %v391_v43 = vmul.f32 %v1101_v23, %v328_v39  ;;  %v390_v44 = vmul.f32 %v1101_v23, %v323_v40  ;;  %v995_v35 = vld [vmem:[%s1215_s5 + $0x10] sm:$0xff]  }
  0x9a   : > { %958 = vmatprep.subr.bf16.mxu1 %v995_v35 }
  0x9b   : > { %v442_v45 = vpack.c.bf16 %v428_v41, %v427_v37  ;;  %v414_v46 = vadd.f32 %v1106_v26, %v391_v43  ;;  %v413_v47 = vadd.f32 %v1106_v26, %v390_v44  ;;  %v441_v48 = vpack.c.bf16 %v426_v42, %v425_v38  ;;  %959 = vmatpush3.bf16.msra.mxu1 %v995_v35 }
  0x9c   : > { %v338_v49 = vpop.permute.xlu1 %337  ;;  %v333_v50 = vpop.permute.xlu0 %332 }
  0x9d   : > { %v430_v51 = vmax.f32 %v414_v46, 0.0  ;;  %v429_v52 = vmax.f32 %v413_v47, 0.0  ;;  %v393_v53 = vmul.f32 %v1101_v23, %v338_v49  ;;  %v392_v54 = vmul.f32 %v1101_v23, %v333_v50  ;;  %938 = vmatprep.mubr.msk.bf16.mxu0 %vm488_vm0, %v441_v48 }
  0x9e   : > { %939 = vmatmul.mubr.msk.bf16.vlgmr.msra.gmra.mrb[0].mxu0 %vm488_vm0, %v442_v45 }
  0x9f   : > { %v443_v55 = vpack.c.bf16 %v430_v51, %v429_v52  ;;  %v416_v56 = vadd.f32 %v1106_v26, %v393_v53  ;;  %v415_v57 = vadd.f32 %v1106_v26, %v392_v54 }
  0xa0   : > { %v348_v58 = vpop.permute.xlu1 %347  ;;  %v343_v59 = vpop.permute.xlu0 %342 }
  0xa1   : > { %v432_v60 = vmax.f32 %v416_v56, 0.0  ;;  %v431_v61 = vmax.f32 %v415_v57, 0.0  ;;  %v395_v62 = vmul.f32 %v1101_v23, %v348_v58  ;;  %v394_v63 = vmul.f32 %v1101_v23, %v343_v59  ;;  %942 = vmatprep.mubr.msk.bf16.mxu0 %vm488_vm0, %v443_v55 }
  0xa3   : > { %v444_v0 = vpack.c.bf16 %v432_v60, %v431_v61  ;;  %v418_v1 = vadd.f32 %v1106_v26, %v395_v62  ;;  %v417_v2 = vadd.f32 %v1106_v26, %v394_v63 }
  0xa4   : > { %v358_v3 = vpop.permute.xlu1 %357  ;;  %v353_v4 = vpop.permute.xlu0 %352 }
  0xa5   : > { %v434_v5 = vmax.f32 %v418_v1, 0.0  ;;  %v433_v6 = vmax.f32 %v417_v2, 0.0  ;;  %v397_v7 = vmul.f32 %v1101_v23, %v358_v3  ;;  %v396_v8 = vmul.f32 %v1101_v23, %v353_v4 }
  0xa6   : > { %943 = vmatmul.mubr.msk.bf16.gmra.mrb[4].mxu0 %vm488_vm0, %v444_v0 }
  0xa7   : > { %v445_v9 = vpack.c.bf16 %v434_v5, %v433_v6  ;;  %v420_v10 = vadd.f32 %v1106_v26, %v397_v7  ;;  %v419_v11 = vadd.f32 %v1106_v26, %v396_v8 }
  0xa8   : > { %v368_v12 = vpop.permute.xlu1 %367  ;;  %v363_v13 = vpop.permute.xlu0 %362 }
  0xa9   : > { %v436_v14 = vmax.f32 %v420_v10, 0.0  ;;  %v435_v15 = vmax.f32 %v419_v11, 0.0  ;;  %v399_v16 = vmul.f32 %v1101_v23, %v368_v12  ;;  %v398_v17 = vmul.f32 %v1101_v23, %v363_v13  ;;  %946 = vmatprep.mubr.msk.bf16.mxu0 %vm488_vm0, %v445_v9 }
  0xab   : > { %v446_v18 = vpack.c.bf16 %v436_v14, %v435_v15  ;;  %v422_v19 = vadd.f32 %v1106_v26, %v399_v16  ;;  %v421_v20 = vadd.f32 %v1106_v26, %v398_v17 }
  0xac   : > { %v378_v21 = vpop.permute.xlu1 %377  ;;  %v373_v22 = vpop.permute.xlu0 %372 }
  0xad   : > { %v438_v24 = vmax.f32 %v422_v19, 0.0  ;;  %v437_v25 = vmax.f32 %v421_v20, 0.0  ;;  %v401_v27 = vmul.f32 %v1101_v23, %v378_v21  ;;  %v400_v28 = vmul.f32 %v1101_v23, %v373_v22  ;;  %v996_v23 = vld [vmem:[%s1215_s5 + $0x18] sm:$0xff]  }
  0xae   : > { %947 = vmatmul.mubr.msk.bf16.gmra.mrb[8].mxu0 %vm488_vm0, %v446_v18  ;;  %960 = vmatprep.subr.bf16.mxu1 %v996_v23 }
  0xaf   : > { %v447_v29 = vpack.c.bf16 %v438_v24, %v437_v25  ;;  %v424_v30 = vadd.f32 %v1106_v26, %v401_v27  ;;  %v423_v31 = vadd.f32 %v1106_v26, %v400_v28  ;;  %961 = vmatpush3.bf16.msra.mxu1 %v996_v23  ;;  %v878_v26 = vld [vmem:[%s1214_s4] ss:$0 sm:$0xff] }
  0xb1   : > { %v440_v32 = vmax.f32 %v424_v30, 0.0  ;;  %v439_v33 = vmax.f32 %v423_v31, 0.0  ;;  %950 = vmatprep.mubr.msk.bf16.mxu0 %vm488_vm0, %v447_v29  ;;  %v891_v30 = vld [vmem:[%s1216_s6] ss:$0 sm:$0xff] }
  0xb3   : > { %v448_v34 = vpack.c.bf16 %v440_v32, %v439_v33 }
  0xb6   : > { %951 = vmatmul.mubr.msk.bf16.gmra.mrb[12].mxu0 %vm488_vm0, %v448_v34 }
 0x171   : > { %v940_v36 = vpop.f32.mrb[0].mxu0 }
 0x172   : > { %v556_v37 = vadd.f32 %v940_v36, %v878_v26  ;;  %v547_v38 = vpop.f32.mrb[1].mxu0 }
 0x173   : > { %v548_v39 = vadd.f32 %v878_v26, %v547_v38  ;;  %v941_v40 = vpop.f32.mrb[2].mxu0 }
 0x174   : > { %v559_v41 = vadd.f32 %v941_v40, %v878_v26  ;;  %v550_v42 = vpop.f32.mrb[3].mxu0  ;;  %v612_v44 = vmax.f32 %v556_v37, 0.0 }
 0x175   : > { %v551_v43 = vadd.f32 %v878_v26, %v550_v42  ;;  %v610_v46 = vmax.f32 %v548_v39, 0.0 }
 0x176   : > { %v613_v45 = vmax.f32 %v559_v41, 0.0 }
 0x177   : > { %v611_v47 = vmax.f32 %v551_v43, 0.0 }
 0x178   : > { %v627_v48 = vpack.c.bf16 %v613_v45, %v612_v44 }
 0x179   : > { %v944_v49 = vpop.f32.mrb[4].mxu0  ;;  %v626_v50 = vpack.c.bf16 %v611_v47, %v610_v46 }
 0x17a   : > { %v572_v51 = vadd.f32 %v944_v49, %v878_v26  ;;  %v563_v52 = vpop.f32.mrb[5].mxu0 }
 0x17b   : > { %v564_v53 = vadd.f32 %v878_v26, %v563_v52  ;;  %v945_v54 = vpop.f32.mrb[6].mxu0  ;;  %962 = vmatprep.mubr.msk.bf16.mxu1 %vm488_vm0, %v626_v50 }
 0x17c   : > { %v575_v55 = vadd.f32 %v945_v54, %v878_v26  ;;  %v566_v56 = vpop.f32.mrb[7].mxu0  ;;  %963 = vmatmul.mubr.msk.bf16.vlgmr.msra.gmra.mrb[0].mxu1 %vm488_vm0, %v627_v48  ;;  %v616_v58 = vmax.f32 %v572_v51, 0.0 }
 0x17d   : > { %v567_v57 = vadd.f32 %v878_v26, %v566_v56  ;;  %v614_v60 = vmax.f32 %v564_v53, 0.0 }
 0x17e   : > { %v617_v59 = vmax.f32 %v575_v55, 0.0 }
 0x17f   : > { %v615_v61 = vmax.f32 %v567_v57, 0.0 }
 0x180   : > { %v629_v62 = vpack.c.bf16 %v617_v59, %v616_v58 }
 0x181   : > { %v628_v63 = vpack.c.bf16 %v615_v61, %v614_v60  ;;  %v948_v0 = vpop.f32.mrb[8].mxu0 }
 0x182   : > { %v588_v1 = vadd.f32 %v948_v0, %v878_v26  ;;  %v579_v2 = vpop.f32.mrb[9].mxu0 }
 0x183   : > { %v580_v3 = vadd.f32 %v878_v26, %v579_v2  ;;  %v949_v4 = vpop.f32.mrb[10].mxu0  ;;  %966 = vmatprep.mubr.msk.bf16.mxu1 %vm488_vm0, %v628_v63 }
 0x184   : > { %v591_v5 = vadd.f32 %v949_v4, %v878_v26  ;;  %v582_v6 = vpop.f32.mrb[11].mxu0  ;;  %967 = vmatmul.mubr.msk.bf16.gmra.mrb[4].mxu1 %vm488_vm0, %v629_v62  ;;  %v620_v8 = vmax.f32 %v588_v1, 0.0 }
 0x185   : > { %v583_v7 = vadd.f32 %v878_v26, %v582_v6  ;;  %v618_v10 = vmax.f32 %v580_v3, 0.0 }
 0x186   : > { %v621_v9 = vmax.f32 %v591_v5, 0.0 }
 0x187   : > { %v619_v11 = vmax.f32 %v583_v7, 0.0 }
 0x188   : > { %v631_v12 = vpack.c.bf16 %v621_v9, %v620_v8 }
 0x189   : > { %v630_v13 = vpack.c.bf16 %v619_v11, %v618_v10  ;;  %v952_v14 = vpop.f32.mrb[12].mxu0 }
 0x18a   : > { %v604_v15 = vadd.f32 %v952_v14, %v878_v26  ;;  %v595_v16 = vpop.f32.mrb[13].mxu0 }
 0x18b   : > { %v596_v17 = vadd.f32 %v878_v26, %v595_v16  ;;  %v953_v18 = vpop.f32.mrb[14].mxu0  ;;  %970 = vmatprep.mubr.msk.bf16.mxu1 %vm488_vm0, %v630_v13 }
 0x18c   : > { %v607_v19 = vadd.f32 %v953_v18, %v878_v26  ;;  %v598_v20 = vpop.f32.mrb[15].mxu0  ;;  %971 = vmatmul.mubr.msk.bf16.gmra.mrb[8].mxu1 %vm488_vm0, %v631_v12  ;;  %v624_v22 = vmax.f32 %v604_v15, 0.0 }
 0x18d   : > { %v599_v21 = vadd.f32 %v878_v26, %v598_v20  ;;  %v622_v25 = vmax.f32 %v596_v17, 0.0 }
 0x18e   : > { %v625_v24 = vmax.f32 %v607_v19, 0.0 }
 0x18f   : > { %v623_v27 = vmax.f32 %v599_v21, 0.0 }
 0x190   : > { %v633_v28 = vpack.c.bf16 %v625_v24, %v624_v22 }
 0x191   : > { %v632_v29 = vpack.c.bf16 %v623_v27, %v622_v25 }
 0x193   : > { %974 = vmatprep.mubr.msk.bf16.mxu1 %vm488_vm0, %v632_v29 }
 0x194   : > { %975 = vmatmul.mubr.msk.bf16.gmra.mrb[12].mxu1 %vm488_vm0, %v633_v28 }
 0x24f   : > { %v964_v31 = vpop.f32.mrb[0].mxu1 }
 0x250   : > { %v740_v32 = vadd.f32 %v964_v31, %v891_v30  ;;  %v731_v33 = vpop.f32.mrb[1].mxu1 }
 0x251   : > { %v732_v34 = vadd.f32 %v891_v30, %v731_v33  ;;  %v965_v35 = vpop.f32.mrb[2].mxu1 }
 0x252   : > { %797 = vst.msk [vmem:[%s1173_s14 + $0x10] sm:$0xff] %vm794_vm1, %v740_v32  ;;  %v743_v23 = vadd.f32 %v965_v35, %v891_v30  ;;  %v734_v26 = vpop.f32.mrb[3].mxu1 }
 0x253   : > { %795 = vst.msk [vmem:[%s1173_s14] sm:$0xff] %vm794_vm1, %v732_v34  ;;  %v735_v36 = vadd.f32 %v891_v30, %v734_v26 }
 0x254   : > { %798 = vst.msk [vmem:[%s1173_s14 + $0x18] sm:$0xff] %vm794_vm1, %v743_v23 }
 0x255   : > { %796 = vst.msk [vmem:[%s1173_s14 + $0x8] sm:$0xff] %vm794_vm1, %v735_v36 }
 0x257   : > { %v968_v37 = vpop.f32.mrb[4].mxu1 }
 0x258   : > { %v756_v38 = vadd.f32 %v968_v37, %v891_v30  ;;  %v747_v39 = vpop.f32.mrb[5].mxu1 }
 0x259   : > { %v748_v40 = vadd.f32 %v891_v30, %v747_v39  ;;  %v969_v41 = vpop.f32.mrb[6].mxu1 }
 0x25a   : > { %801 = vst.msk [vmem:[%s1173_s14 + $0x30] sm:$0xff] %vm794_vm1, %v756_v38  ;;  %v759_v42 = vadd.f32 %v969_v41, %v891_v30  ;;  %v750_v43 = vpop.f32.mrb[7].mxu1 }
 0x25b   : > { %799 = vst.msk [vmem:[%s1173_s14 + $0x20] sm:$0xff] %vm794_vm1, %v748_v40  ;;  %v751_v44 = vadd.f32 %v891_v30, %v750_v43 }
 0x25c   : > { %802 = vst.msk [vmem:[%s1173_s14 + $0x38] sm:$0xff] %vm794_vm1, %v759_v42 }
 0x25d   : > { %800 = vst.msk [vmem:[%s1173_s14 + $0x28] sm:$0xff] %vm794_vm1, %v751_v44 }
 0x25f   : > { %v972_v45 = vpop.f32.mrb[8].mxu1 }
 0x260   : > { %v772_v46 = vadd.f32 %v972_v45, %v891_v30  ;;  %v763_v47 = vpop.f32.mrb[9].mxu1 }
 0x261   : > { %v764_v48 = vadd.f32 %v891_v30, %v763_v47  ;;  %v973_v49 = vpop.f32.mrb[10].mxu1 }
 0x262   : > { %805 = vst.msk [vmem:[%s1173_s14 + $0x50] sm:$0xff] %vm794_vm1, %v772_v46  ;;  %v775_v50 = vadd.f32 %v973_v49, %v891_v30  ;;  %v766_v51 = vpop.f32.mrb[11].mxu1 }
 0x263   : > { %803 = vst.msk [vmem:[%s1173_s14 + $0x40] sm:$0xff] %vm794_vm1, %v764_v48  ;;  %v767_v52 = vadd.f32 %v891_v30, %v766_v51 }
 0x264   : > { %806 = vst.msk [vmem:[%s1173_s14 + $0x58] sm:$0xff] %vm794_vm1, %v775_v50 }
 0x265   : > { %804 = vst.msk [vmem:[%s1173_s14 + $0x48] sm:$0xff] %vm794_vm1, %v767_v52 }
 0x267   : > { %v976_v53 = vpop.f32.mrb[12].mxu1 }
 0x268   : > { %v788_v54 = vadd.f32 %v976_v53, %v891_v30  ;;  %v779_v55 = vpop.f32.mrb[13].mxu1 }
 0x269   : > { %v780_v56 = vadd.f32 %v891_v30, %v779_v55  ;;  %v977_v57 = vpop.f32.mrb[14].mxu1 }
 0x26a   : > { %809 = vst.msk [vmem:[%s1173_s14 + $0x70] sm:$0xff] %vm794_vm1, %v788_v54  ;;  %v791_v58 = vadd.f32 %v977_v57, %v891_v30  ;;  %v782_v59 = vpop.f32.mrb[15].mxu1 }
 0x26b   : > { %807 = vst.msk [vmem:[%s1173_s14 + $0x60] sm:$0xff] %vm794_vm1, %v780_v56  ;;  %v783_v60 = vadd.f32 %v891_v30, %v782_v59 }
 0x26c   : > { %810 = vst.msk [vmem:[%s1173_s14 + $0x78] sm:$0xff] %vm794_vm1, %v791_v58 }
 0x26d   : > { %808 = vst.msk [vmem:[%s1173_s14 + $0x68] sm:$0xff] %vm794_vm1, %v783_v60 }
 0x26e PF: > { %s17_s24 = sadd.s32 1, %s1003_s24  }
 0x26f   : > { %p14_p4 = scmp.ge.s32.totalorder %s17_s24, 5  }
 0x271   :  { %16 = sbr.rel (!%p14_p4) target bundleno = 1 (0x1), region = 78 }

</bundles_post_ra>
